<compile_context>
chip_gen: v6e
topology: v6e:2x2x1
jax: 0.10.0
libtpu: 0.0.40
codegen_flags: <defaults>
</compile_context>

<pallas_src>
import enum
import functools
import numbers
from dataclasses import dataclass, field
from typing import Any, Dict, List, Tuple

import jax
import jax.numpy as jnp
from jax import lax
from jax.experimental import pallas as pl
from jax.experimental.pallas import tpu as pltpu


# ----------------------------------------------------------------------------
# Tiling helpers
# ----------------------------------------------------------------------------
def _round_up(x: int, m: int) -> int:
    return ((x + m - 1) // m) * m


def _cdiv(a: int, b: int) -> int:
    return -(-a // b)


@functools.lru_cache(maxsize=None)
def _vmem_plan() -> Tuple[int, int]:
    """Per-generation VMEM plan.

    Returns (resident_input_budget_bytes, vmem_limit_bytes):
      * resident_input_budget: total bytes allowed for the double-buffered
        input blocks (2 buffers x (preds block + labels block), lane-padded).
      * vmem_limit_bytes: value passed to pltpu.CompilerParams.
    """
    kind = ""
    try:
        kind = (getattr(jax.devices()[0], "device_kind", "") or "").lower()
    except Exception:
        kind = ""
    phys = None
    try:
        phys = int(getattr(pltpu.get_tpu_info(), "vmem_capacity_bytes", 0)) or None
    except Exception:
        phys = None

    if ("v5 lite" in kind) or ("v5e" in kind) or ("v5lite" in kind):
        budget, limit = 12 << 20, 48 << 20      # v5e: keep well clear of scoped VMEM
    elif "v6" in kind:
        budget, limit = 56 << 20, 96 << 20      # v6e: 128 MiB physical VMEM
    elif "7" in kind:
        budget, limit = 36 << 20, 48 << 20      # v7x: only 64 MiB physical per TC
    else:
        budget, limit = 24 << 20, 64 << 20      # conservative default (v4/v5p/...)

    if phys:                                     # clamp to the real chip if known
        limit = min(limit, int(phys * 0.75))
        budget = min(budget, int(phys * 0.55))
    return budget, limit


def _choose_tile_b(b: int, c: int, stream_dtype, budget_bytes: int) -> int:
    """Largest sublane-aligned batch tile whose double-buffered inputs fit the
    per-generation VMEM budget.  Lane padding (C -> round_up(C,128)) is counted,
    because that is the real VMEM footprint of the block."""
    lane_c = _round_up(c, 128)
    preds_row = lane_c * jnp.dtype(stream_dtype).itemsize     # lane-padded preds row
    label_row = 128 * 4                                       # lane-padded i32 label col
    cap = budget_bytes // (2 * (preds_row + label_row))       # 2x = double buffering
    cap = max(16, (cap // 16) * 16)
    tile = min(cap, _round_up(max(b, 1), 16))                 # never bigger than batch
    return max(16, (tile // 16) * 16)                         # mult of 16: bf16-safe sublanes


# ----------------------------------------------------------------------------
# Pallas kernel: per-batch metric statistics (streaming reduction hot path)
# ----------------------------------------------------------------------------
def _metric_update_kernel(preds_ref, labels_ref, correct_ref, sqerr_ref,
                          corr_acc, sq_acc, *, n_valid, tile_b, masked):
    i = pl.program_id(0)   # reduction step over batch tiles

    @pl.when(i == 0)
    def _init():
        corr_acc[...] = jnp.zeros_like(corr_acc)
        sq_acc[...] = jnp.zeros_like(sq_acc)

    # Stream in native dtype (bf16 or f32); cast per tile on the VPU.
    preds = preds_ref[...].astype(jnp.float32)     # [tile_b, C]
    labels = labels_ref[...]                       # [tile_b, 1] i32 class ids
    c = preds.shape[-1]

    col = lax.broadcasted_iota(jnp.int32, (tile_b, c), 1)
    onehot = col == labels                         # implicit (never materialized) one-hot
    p_at = jnp.where(onehot, preds, 0.0)           # preds at the label, 0 elsewhere

    # Two full-width cross-lane reduces per tile (the unavoidable XLU work).
    p_at_label = jnp.sum(p_at, axis=-1, keepdims=True)        # [tile_b, 1]
    row_max = jnp.max(preds, axis=-1, keepdims=True)          # [tile_b, 1]

    # Accuracy hit test: ">=" counts exact-tie rows as hits (torch argmax uses
    # first occurrence); ties between float logits are measure-zero.
    hit = (p_at_label >= row_max).astype(jnp.float32)         # [tile_b, 1]

    # Fused MSE contribution vs the one-hot target:
    #   sum_j (p_j - oh_j)^2 = sum_j (p_j^2 - 2*p_j*oh_j) + 1   (per valid row)
    # The "+1 per valid row" constant is added once in the wrapper.
    sq_elem = preds * preds - 2.0 * p_at                      # [tile_b, C]

    if masked:
        # Ragged batch: the last block reads past the array end; that region is
        # undefined (possibly NaN/Inf), so mask with where (NOT multiply-by-0).
        row = i * tile_b + lax.broadcasted_iota(jnp.int32, (tile_b, 1), 0)
        valid = row < n_valid                                  # [tile_b, 1] bool
        hit = jnp.where(valid, hit, 0.0)
        sq_elem = jnp.where(valid, sq_elem, 0.0)

    # Accumulate in VMEM scratch; cross-lane reduce to a scalar only at the end.
    corr_acc[...] += jnp.sum(hit, keepdims=True)               # narrow [tile_b,1] reduce
    sq_acc[...] += jnp.sum(sq_elem, axis=0, keepdims=True)     # keep lanes: (1, C)

    # Write the two scalars exactly once, at the last step (the single masked
    # sub-128-lane store per launch is negligible).
    @pl.when(i == pl.num_programs(0) - 1)
    def _flush():
        correct_ref[...] = corr_acc[...]
        sqerr_ref[...] = jnp.sum(sq_acc[...], axis=-1, keepdims=True)


@jax.jit
def metric_batch_stats(preds: jax.Array, labels: jax.Array) -> Tuple[jax.Array, jax.Array]:
    """One Pallas launch per batch. Returns (num_correct, sum_sq_error_vs_onehot)."""
    if preds.ndim != 2:
        raise ValueError(f"preds must be [batch, num_classes], got {preds.shape}")
    # Stream bf16/f32 directly; anything else is cast once (no bf16->f32 HBM copy).
    if preds.dtype not in (jnp.float32, jnp.bfloat16):
        preds = preds.astype(jnp.float32)
    labels = labels.astype(jnp.int32).reshape(-1, 1)
    b, c = preds.shape

    budget, vmem_limit = _vmem_plan()
    tile_b = _choose_tile_b(b, c, preds.dtype, budget)
    steps = _cdiv(b, tile_b)
    masked = (steps * tile_b != b)                 # ragged / partial last block

    kernel = functools.partial(_metric_update_kernel,
                               n_valid=b, tile_b=tile_b, masked=masked)

    correct, sqerr = pl.pallas_call(
        kernel,
        out_shape=(
            jax.ShapeDtypeStruct((1, 1), jnp.float32),
            jax.ShapeDtypeStruct((1, 1), jnp.float32),
        ),
        grid=(steps,),
        in_specs=[
            pl.BlockSpec((tile_b, c), lambda i: (i, 0)),
            pl.BlockSpec((tile_b, 1), lambda i: (i, 0)),
        ],
        out_specs=(
            pl.BlockSpec((1, 1), lambda i: (0, 0)),
            pl.BlockSpec((1, 1), lambda i: (0, 0)),
        ),
        scratch_shapes=[
            pltpu.VMEM((1, 1), jnp.float32),   # accuracy counter
            pltpu.VMEM((1, c), jnp.float32),   # MSE lane accumulator
        ],
        compiler_params=pltpu.CompilerParams(
            dimension_semantics=("arbitrary",),     # single reduction axis
            vmem_limit_bytes=vmem_limit),
    )(preds, labels)

    # "+ b": each valid row contributes +1 from sum_j onehot_j^2.
    return correct[0, 0], sqerr[0, 0] + jnp.float32(b)


@jax.jit
def _accumulate2(a, b, da, db):
    """Jitted metric-state update (keeps the scalar adds off the eager path)."""
    return a + da, b + db


# ----------------------------------------------------------------------------
# Minimal metric implementations backed by the Pallas kernel
# ----------------------------------------------------------------------------
# TODO(synk): f32 accumulators lose integer exactness past 2^24 samples/elements
# per epoch; switch to int32/f64 host-side accumulation for very long epochs.
class PallasAccuracy:
    """Accuracy metric; states updated from Pallas kernel outputs."""

    def __init__(self, num_classes: int):
        self.num_classes = num_classes
        self.reset()

    def reset(self):
        self._correct = jnp.zeros((), jnp.float32)
        self._total = jnp.zeros((), jnp.float32)

    def update(self, preds, target, _stats=None):
        if _stats is None:
            _stats = metric_batch_stats(preds, target)
        correct, _ = _stats
        self._correct, self._total = _accumulate2(
            self._correct, self._total, correct, jnp.float32(preds.shape[0]))

    def compute(self):
        return self._correct / self._total


class PallasMeanSquaredError:
    """Elementwise MSE between logits and one-hot targets (denominator = B*C)."""

    def __init__(self, num_classes: int):
        self.num_classes = num_classes
        self.reset()

    def reset(self):
        self._sum_sq = jnp.zeros((), jnp.float32)
        self._n_obs = jnp.zeros((), jnp.float32)

    def update(self, preds, target, _stats=None):
        if _stats is None:
            _stats = metric_batch_stats(preds, target)
        _, sqerr = _stats
        self._sum_sq, self._n_obs = _accumulate2(
            self._sum_sq, self._n_obs, sqerr, jnp.float32(preds.size))

    def compute(self):
        return self._sum_sq / self._n_obs


METRICS = {
    "Accuracy": PallasAccuracy,
    "MeanSquaredError": PallasMeanSquaredError,
}


# ----------------------------------------------------------------------------
# Manager plumbing (faithful to the PyTorch module's control flow)
# ----------------------------------------------------------------------------
class Phase(enum.Enum):
    TRAIN = "train"
    VALID = "valid"
    TEST = "test"


@dataclass
class MetricParams:
    name: str
    mapping: Dict[str, str]
    params: Dict[str, Any] = field(default_factory=dict)
    prefix: Any = None
    phases: List[Phase] = field(default_factory=lambda: list(Phase))


class MetricWithUtils:
    """Union class for metric and metric utils parameters."""

    def __init__(self, metric, mapping: Dict[str, str], log_name: str):
        self._metric = metric
        self._mapping = mapping
        self._log_name = log_name

    @property
    def metric(self):
        return self._metric

    @property
    def log_name(self) -> str:
        return self._log_name

    @property
    def mapping(self) -> Dict[str, str]:
        return self._mapping

    def __call__(self, *args, **kwargs):
        # TODO(synk): torchmetrics' forward() cache/reset/update/compute/restore
        # dance has no Pallas equivalent; the manager only uses update() anyway.
        self._metric.update(*args, **kwargs)
        return self._metric.compute()

    def update(self, *args, **kwargs):
        self._metric.update(*args, **kwargs)

    def compute(self):
        return self._metric.compute()

    def reset(self):
        self._metric.reset()


class MetricsManager:
    """Manages all metrics for a Task (JAX/Pallas version)."""

    def __init__(self, params: List[MetricParams]):
        self.__phase2metrics: Dict[str, List[MetricWithUtils]] = {}
        for phase in Phase:
            self.__phase2metrics[phase.name] = self.__get_phase_metrics(params, phase)

    def __get_phase_metrics(self, params: List[MetricParams], phase: Phase) -> List[MetricWithUtils]:
        added_log_names = []
        metrics = []
        for metric_params in params:
            if phase not in metric_params.phases:
                continue
            metric = METRICS[metric_params.name](**metric_params.params)
            mapping = metric_params.mapping
            prefix = "" if metric_params.prefix is None else metric_params.prefix + "_"
            log_name = prefix + metric_params.name
            if log_name in added_log_names:
                raise ValueError(
                    f"Got two metrics with identical names: {log_name}. "
                    "Please, set differet prefixes for identical metrics in the config file."
                )
            added_log_names.append(log_name)
            metrics.append(MetricWithUtils(metric=metric, mapping=mapping, log_name=log_name))
        return metrics

    def __call__(self, phase: Phase, *args, **kwargs):
        return self.forward(phase, *args, **kwargs)

    def forward(self, phase: Phase, *args, **kwargs):
        """Update states of all metrics on phase loop (update-only, like the PyTorch version).

        Optimization: the Pallas stats kernel is launched once per unique
        (preds, target) pair in this batch and its outputs are shared by all
        metrics that consume that pair.
        """
        args = list(args)
        stats_cache: Dict[Tuple[int, int], Tuple[jax.Array, jax.Array]] = {}
        for metric_with_utils in self.__phase2metrics[phase.name]:
            targeted_kwargs = self.map_arguments(metric_with_utils.mapping, kwargs)
            preds = targeted_kwargs.get("preds")
            target = targeted_kwargs.get("target")
            if preds is not None and target is not None:
                key = (id(preds), id(target))
                if key not in stats_cache:
                    stats_cache[key] = metric_batch_stats(preds, target)
                targeted_kwargs["_stats"] = stats_cache[key]
            metric_with_utils.update(*args, **targeted_kwargs)

    def on_epoch_end(self, phase: Phase) -> Dict[str, Any]:
        log = {}
        for metric_with_utils in self.__phase2metrics[phase.name]:
            metric_value = metric_with_utils.compute()
            if isinstance(metric_value, jax.Array) and len(metric_value.shape) != 0:
                raise ValueError(
                    f"{metric_with_utils.log_name} must compute number value, "
                    f"not tensor with shape {metric_value.shape}."
                )
            is_number = isinstance(metric_value, numbers.Number)
            if not (is_number or isinstance(metric_value, jax.Array)):
                raise ValueError(
                    f"{metric_with_utils.log_name} must compute a number value."
                )
            metric_key = f"{phase.value}/{metric_with_utils.log_name}"
            log[metric_key] = metric_value
            metric_with_utils.reset()
        return log

    @staticmethod
    def map_arguments(mapping: Dict[str, str], task_output: Dict[str, Any]) -> Dict[str, Any]:
        metric_input = {}
        for metric_target, metric_source in mapping.items():
            if metric_source in task_output:
                metric_input[metric_target] = task_output[metric_source]
            else:
                raise ValueError(
                    f"Cannot find {metric_source} for your mapping {metric_target} : {metric_source}. "
                    f"You should either add {metric_source} output to your model or remove the mapping "
                    "from configuration"
                )
        return metric_input

    @property
    def phase2metrics(self) -> Dict[str, List[MetricWithUtils]]:
        return self.__phase2metrics


# ----------------------------------------------------------------------------
# Demo / smoke test
# ----------------------------------------------------------------------------
if __name__ == "__main__":
    C = 32  # num classes
    key = jax.random.PRNGKey(0)
    k1, k2, k3, k4 = jax.random.split(key, 4)

    # Synthetic "task outputs" for two batches; the second is ragged (12 rows)
    # to exercise the in-kernel partial-block masking.
    preds0 = jax.random.normal(k1, (16, C), dtype=jnp.float32)
    tgt0 = jax.random.randint(k2, (16,), 0, C, dtype=jnp.int32)
    preds1 = jax.random.normal(k3, (12, C), dtype=jnp.float32)
    tgt1 = jax.random.randint(k4, (12,), 0, C, dtype=jnp.int32)

    params = [
        MetricParams(
            name="Accuracy",
            mapping={"preds": "prediction", "target": "target"},
            params={"num_classes": C},
            phases=[Phase.TRAIN, Phase.VALID],
        ),
        MetricParams(
            name="MeanSquaredError",
            mapping={"preds": "prediction", "target": "target"},
            params={"num_classes": C},
            prefix="onehot",
            phases=[Phase.TRAIN],
        ),
    ]

    manager = MetricsManager(params)

    # Two update steps (as in a phase loop), then epoch-end compute.
    manager(Phase.TRAIN, prediction=preds0, target=tgt0)
    manager(Phase.TRAIN, prediction=preds1, target=tgt1)
    log = manager.on_epoch_end(Phase.TRAIN)
    for value in log.values():
        jax.block_until_ready(value)

    # Pure-JAX reference check.
    def _ref_stats(p, t):
        oh = jax.nn.one_hot(t, C, dtype=jnp.float32)
        correct = jnp.sum((jnp.argmax(p, axis=-1) == t).astype(jnp.float32))
        sq = jnp.sum((p - oh) ** 2)
        return correct, sq

    c0, s0 = _ref_stats(preds0, tgt0)
    c1, s1 = _ref_stats(preds1, tgt1)
    ref_acc = float((c0 + c1) / (preds0.shape[0] + preds1.shape[0]))
    ref_mse = float((s0 + s1) / (preds0.size + preds1.size))

    got_acc = float(log["train/Accuracy"])
    got_mse = float(log["train/onehot_MeanSquaredError"])
    assert abs(got_acc - ref_acc) < 1e-5, (got_acc, ref_acc)
    assert abs(got_mse - ref_mse) < 2e-3 * max(1.0, abs(ref_mse)), (got_mse, ref_mse)

    print("KERNEL_OK")
</pallas_src>

<mosaic_0001>
module attributes {stable_mosaic.version = 11 : i64} {
  func.func @_metric_update_kernel(%arg0: i32, %arg1: memref<16x32xf32, #tpu.memory_space<vmem>>, %arg2: memref<16x1xi32, #tpu.memory_space<vmem>>, %arg3: memref<1x1xf32, #tpu.memory_space<vmem>>, %arg4: memref<1x1xf32, #tpu.memory_space<vmem>>, %arg5: memref<1x1xf32, #tpu.memory_space<vmem>>, %arg6: memref<1x32xf32, #tpu.memory_space<vmem>>) attributes {dimension_semantics = [#tpu.dimension_semantics<arbitrary>], iteration_bounds = array<i64: 1>, scalar_prefetch = 0 : i64, scratch_operands = 2 : i64, tpu.core_type = #tpu.core_type<tc>, window_params = [{transform_indices = @transform_0, window_bounds = array<i64: 16, 32>}, {transform_indices = @transform_1, window_bounds = array<i64: 16, 1>}, {pipeline_mode = #tpu.pipeline_mode<synchronous>, transform_indices = @transform_2, window_bounds = array<i64: 1, 1>}, {pipeline_mode = #tpu.pipeline_mode<synchronous>, transform_indices = @transform_3, window_bounds = array<i64: 1, 1>}]} {
    %c0_i32 = arith.constant 0 : i32
    %0 = arith.cmpi eq, %arg0, %c0_i32 : i32
    %1 = arith.extui %0 : i1 to i32
    %c0_i32_0 = arith.constant 0 : i32
    %2 = arith.cmpi ne, %1, %c0_i32_0 : i32
    scf.if %2 {
      %cst_19 = arith.constant 0.000000e+00 : f32
      %37 = vector.broadcast %cst_19 : f32 to vector<1x1xf32>
      %c0_20 = arith.constant 0 : index
      %c0_21 = arith.constant 0 : index
      %38 = vector.load %arg5[%c0_20, %c0_21] : memref<1x1xf32, #tpu.memory_space<vmem>>, vector<1x1xf32>
      tpu.vector_store %arg5[%c0_20, %c0_21], %37 {strides = array<i32>} : memref<1x1xf32, #tpu.memory_space<vmem>>, vector<1x1xf32>,
      %cst_22 = arith.constant 0.000000e+00 : f32
      %39 = vector.broadcast %cst_22 : f32 to vector<1x32xf32>
      %c0_23 = arith.constant 0 : index
      %c0_24 = arith.constant 0 : index
      %40 = vector.load %arg6[%c0_23, %c0_24] : memref<1x32xf32, #tpu.memory_space<vmem>>, vector<1x32xf32>
      tpu.vector_store %arg6[%c0_23, %c0_24], %39 {strides = array<i32>} : memref<1x32xf32, #tpu.memory_space<vmem>>, vector<1x32xf32>,
    } else {
    }
    %c0 = arith.constant 0 : index
    %c0_1 = arith.constant 0 : index
    %3 = vector.load %arg1[%c0, %c0_1] : memref<16x32xf32, #tpu.memory_space<vmem>>, vector<16x32xf32>
    %c0_2 = arith.constant 0 : index
    %c0_3 = arith.constant 0 : index
    %4 = vector.load %arg2[%c0_2, %c0_3] : memref<16x1xi32, #tpu.memory_space<vmem>>, vector<16x1xi32>
    %5 = tpu.iota {dimensions = array<i32: 1>} : vector<16x32xi32>
    %6 = vector.broadcast %4 : vector<16x1xi32> to vector<16x32xi32>
    %7 = arith.cmpi eq, %5, %6 : vector<16x32xi32>
    %cst = arith.constant 0.000000e+00 : f32
    %8 = vector.broadcast %cst : f32 to vector<16x32xf32>
    %9 = arith.select %7, %3, %8 : vector<16x32xi1>, vector<16x32xf32>
    %cst_4 = arith.constant dense<0.000000e+00> : vector<16xf32>
    %10 = vector.multi_reduction <add>, %9, %cst_4 [1] : vector<16x32xf32> to vector<16xf32>
    %11 = vector.shape_cast %10 : vector<16xf32> to vector<16x1xf32>
    %cst_5 = arith.constant dense<0xFF800000> : vector<16xf32>
    %12 = vector.multi_reduction <maximumf>, %3, %cst_5 [1] : vector<16x32xf32> to vector<16xf32>
    %13 = vector.shape_cast %12 : vector<16xf32> to vector<16x1xf32>
    %14 = arith.cmpf oge, %11, %13 : vector<16x1xf32>
    %15 = arith.extui %14 : vector<16x1xi1> to vector<16x1xi32>
    %16 = arith.sitofp %15 : vector<16x1xi32> to vector<16x1xf32>
    %17 = arith.mulf %3, %3 : vector<16x32xf32>
    %cst_6 = arith.constant 2.000000e+00 : f32
    %18 = vector.broadcast %cst_6 : f32 to vector<16x32xf32>
    %19 = arith.mulf %18, %9 : vector<16x32xf32>
    %20 = arith.subf %17, %19 : vector<16x32xf32>
    %c0_7 = arith.constant 0 : index
    %c0_8 = arith.constant 0 : index
    %21 = vector.load %arg5[%c0_7, %c0_8] : memref<1x1xf32, #tpu.memory_space<vmem>>, vector<1x1xf32>
    %22 = vector.shape_cast %16 : vector<16x1xf32> to vector<1x16x1xf32>
    %cst_9 = arith.constant dense<0.000000e+00> : vector<1xf32>
    %23 = vector.multi_reduction <add>, %22, %cst_9 [1, 2] : vector<1x16x1xf32> to vector<1xf32>
    %24 = vector.shape_cast %23 : vector<1xf32> to vector<1x1x1xf32>
    %25 = vector.extract %24[0, 0, 0] : f32 from vector<1x1x1xf32>
    %26 = vector.broadcast %25 : f32 to vector<1x1xf32>
    %27 = arith.addf %21, %26 : vector<1x1xf32>
    %c0_10 = arith.constant 0 : index
    %c0_11 = arith.constant 0 : index
    %28 = vector.load %arg5[%c0_10, %c0_11] : memref<1x1xf32, #tpu.memory_space<vmem>>, vector<1x1xf32>
    tpu.vector_store %arg5[%c0_10, %c0_11], %27 {strides = array<i32>} : memref<1x1xf32, #tpu.memory_space<vmem>>, vector<1x1xf32>,
    %c0_12 = arith.constant 0 : index
    %c0_13 = arith.constant 0 : index
    %29 = vector.load %arg6[%c0_12, %c0_13] : memref<1x32xf32, #tpu.memory_space<vmem>>, vector<1x32xf32>
    %cst_14 = arith.constant dense<0.000000e+00> : vector<32xf32>
    %30 = vector.multi_reduction <add>, %20, %cst_14 [0] : vector<16x32xf32> to vector<32xf32>
    %31 = vector.shape_cast %30 : vector<32xf32> to vector<1x32xf32>
    %32 = arith.addf %29, %31 : vector<1x32xf32>
    %c0_15 = arith.constant 0 : index
    %c0_16 = arith.constant 0 : index
    %33 = vector.load %arg6[%c0_15, %c0_16] : memref<1x32xf32, #tpu.memory_space<vmem>>, vector<1x32xf32>
    tpu.vector_store %arg6[%c0_15, %c0_16], %32 {strides = array<i32>} : memref<1x32xf32, #tpu.memory_space<vmem>>, vector<1x32xf32>,
    %c0_i32_17 = arith.constant 0 : i32
    %34 = arith.cmpi eq, %arg0, %c0_i32_17 : i32
    %35 = arith.extui %34 : i1 to i32
    %c0_i32_18 = arith.constant 0 : i32
    %36 = arith.cmpi ne, %35, %c0_i32_18 : i32
    scf.if %36 {
      %c0_19 = arith.constant 0 : index
      %c0_20 = arith.constant 0 : index
      %37 = vector.load %arg5[%c0_19, %c0_20] : memref<1x1xf32, #tpu.memory_space<vmem>>, vector<1x1xf32>
      %c0_21 = arith.constant 0 : index
      %c0_22 = arith.constant 0 : index
      %38 = vector.load %arg3[%c0_21, %c0_22] : memref<1x1xf32, #tpu.memory_space<vmem>>, vector<1x1xf32>
      tpu.vector_store %arg3[%c0_21, %c0_22], %37 {strides = array<i32>} : memref<1x1xf32, #tpu.memory_space<vmem>>, vector<1x1xf32>,
      %c0_23 = arith.constant 0 : index
      %c0_24 = arith.constant 0 : index
      %39 = vector.load %arg6[%c0_23, %c0_24] : memref<1x32xf32, #tpu.memory_space<vmem>>, vector<1x32xf32>
      %cst_25 = arith.constant dense<0.000000e+00> : vector<1xf32>
      %40 = vector.multi_reduction <add>, %39, %cst_25 [1] : vector<1x32xf32> to vector<1xf32>
      %41 = vector.shape_cast %40 : vector<1xf32> to vector<1x1xf32>
      %c0_26 = arith.constant 0 : index
      %c0_27 = arith.constant 0 : index
      %42 = vector.load %arg4[%c0_26, %c0_27] : memref<1x1xf32, #tpu.memory_space<vmem>>, vector<1x1xf32>
      tpu.vector_store %arg4[%c0_26, %c0_27], %41 {strides = array<i32>} : memref<1x1xf32, #tpu.memory_space<vmem>>, vector<1x1xf32>,
    } else {
    }
    return
  }
  func.func @transform_0(%arg0: i32) -> (i32, i32) {
    %c0_i32 = arith.constant 0 : i32
    %c0_i32_0 = arith.constant 0 : i32
    return %arg0, %c0_i32 : i32, i32
  }
  func.func @transform_1(%arg0: i32) -> (i32, i32) {
    %c0_i32 = arith.constant 0 : i32
    %c0_i32_0 = arith.constant 0 : i32
    return %arg0, %c0_i32 : i32, i32
  }
  func.func @transform_2(%arg0: i32) -> (i32, i32) {
    %c0_i32 = arith.constant 0 : i32
    %c0_i32_0 = arith.constant 0 : i32
    %c0_i32_1 = arith.constant 0 : i32
    return %c0_i32, %c0_i32_0 : i32, i32
  }
  func.func @transform_3(%arg0: i32) -> (i32, i32) {
    %c0_i32 = arith.constant 0 : i32
    %c0_i32_0 = arith.constant 0 : i32
    %c0_i32_1 = arith.constant 0 : i32
    return %c0_i32, %c0_i32_0 : i32, i32
  }
}

</mosaic_0001>

<bundles_post_ra>
// kernel: metric_batch_stats.1
= control target key start
LH: loop header
LB: loop body
LE: loop exit
PB: predicated region body
PF: predicated region fallthrough
CT: control target
= control target key end

     0   :  { %9 = vsyncpa [#allocation5], 0  ;;  %v186_v1 = vmov 0   ;;  %s241_s0 = inlined_call_operand.vmem [shape: f32[16,32], index: 0, kind: input, shape index: {}]   ;;  %s242_s1 = inlined_call_operand.vmem [shape: s32[16,1], index: 1, kind: input, shape index: {}]   ;;  %s243_s2 = inlined_call_operand.hbm [shape: f32[1,1], index: 2, kind: output, shape index: {0}]   ;;  %s244_s3 = inlined_call_operand.hbm [shape: f32[1,1], index: 3, kind: output, shape index: {1}]  }
   0x1   :  { %v25_v0 = vld [vmem:[%s242_s1] sm:$0xff]  ;;  %141 = vset.pattern.permute.xlu0 %v186_v1 }
   0x2   :  { %10 = vsyncpa [#allocation7], 0  ;;  %30 = vperm.xlu0 %141, %v25_v0   ;;  %v26_v2 = vld [vmem:[%s242_s1 + $0x8] sm:$0xff]  ;;  %vm21_vm0 = vcmask 253952   ;;  %v187_v3 = vmov 0.0   ;;  %v23_v4 = vld [vmem:[%s241_s0] sm:$0xff]  ;;  %v27_v6 = vlaneseq }
   0x3   :  { %22 = vst.msk [vmem:[#allocation3] sm:$0x1] %vm21_vm0, %v187_v3  ;;  %vm39_vm1 = vcmask 261120   ;;  %v24_v10 = vld [vmem:[%s241_s0 + $0x8] sm:$0xff]  ;;  %v58_v11 = vmul.f32 %v23_v4, %v23_v4  ;;  %vm65_vm5 = vcmask 7168   ;;  %vm19_vm7 = vcmask 0  }
   0x4   :  { %v46_v5 = vsel %vm39_vm1, %v23_v4, -inf  ;;  %v28_v7 = vand.u32 127, %v27_v6  ;;  %v59_v15 = vmul.f32 %v24_v10, %v24_v10  ;;  %v49_v21 = vsel %vm39_vm1, %v24_v10, -inf  ;;  %20 = vst.msk [vmem:[#allocation2] sm:$0x1] %vm19_vm7, %v187_v3  ;;  %s188_s0 = smov [#allocation6]  }
   0x5   :  { %s121_s19 = sshll.u32 %s188_s0, 4  ;;  %s122_s19 = int_to_ptr.vmem [resolvable:$true] %s121_s19 }
   0x6   :  { %33 = vperm.xlu0 %141, %v26_v2   ;;  %s142_s20 = scalar_lea.vmem %s122_s19, 16  ;;  %s146_s21 = scalar_lea.vmem %s122_s19, 32 }
   0x7   :  { %p143_p0 = scmp.ne.s32.totalorder %s122_s19, %s142_s20  ;;  %p147_p1 = scmp.lt.s32.totalorder %s122_s19, %s122_s19 }
   0x8   :  { %p148_p2 = scmp.lt.s32.totalorder %s146_s21, %s142_s20 }
   0xa   :  { %v82_v30 = vld [vmem:[#allocation3] sm:$0x1]  ;;  %p149_p3 = por %p148_p2, %p147_p1 }
   0xc   :  { %p150_p4 = pnand %p149_p3, %p143_p0 }
  0x25   :  { %47 = vmax.xlane.f32.xlu0 %v46_v5 }
  0x7d   :  { %v31_v8 = vpop.permute.xlu0 %30 }
  0x7e   :  { %vm35_vm2 = vcmp.eq.s32.totalorder %v28_v7, %v31_v8 }
  0x7f   :  { %v37_v9 = vsel %vm35_vm2, %v23_v4, 0.0 }
  0x80   :  { %v40_v12 = vsel %vm39_vm1, %v37_v9, 0.0  ;;  %v60_v13 = vmul.f32 2.0, %v37_v9 }
  0x81   :  { %v34_v14 = vpop.permute.xlu0 %33  ;;  %41 = vadd.xlane.f32.xlu1 %v40_v12 }
  0x82   :  { %vm36_vm3 = vcmp.eq.s32.totalorder %v28_v7, %v34_v14  ;;  %v62_v17 = vsub.f32 %v58_v11, %v60_v13 }
  0x83   :  { %v38_v16 = vsel %vm36_vm3, %v24_v10, 0.0 }
  0x84   :  { %v43_v18 = vsel %vm39_vm1, %v38_v16, 0.0  ;;  %v61_v19 = vmul.f32 2.0, %v38_v16  ;;  %v83_v22 = vsel %vm39_vm1, %v62_v17, 0.0 }
  0x85   :  { %44 = vadd.xlane.f32.xlu1 %v43_v18 }
  0x86   :  { %v63_v20 = vsub.f32 %v59_v15, %v61_v19 }
  0x88   :  { %v84_v23 = vsel %vm39_vm1, %v63_v20, 0.0 }
  0x89   :  { %v85_v24 = vadd.f32 %v84_v23, %v83_v22  ;;  %50 = vmax.xlane.f32.xlu1 %v49_v21 }
  0x8b   :  { %v86_v25 = vrot.slane %v85_v24, 4 }
  0x8d   :  { %v87_v26 = vadd.f32 %v86_v25, %v85_v24 }
  0x8f   :  { %v88_v27 = vrot.slane %v87_v26, 2 }
  0x91   :  { %v89_v28 = vadd.f32 %v88_v27, %v87_v26 }
  0x93   :  { %v90_v29 = vrot.slane %v89_v28, 1 }
  0x95   :  { %v91_v31 = vadd.f32 %v90_v29, %v89_v28 }
  0x97   :  { %v92_v32 = vadd.f32 %v91_v31, %v82_v30 }
  0x99   :  { %94 = vst.msk [vmem:[#allocation3] sm:$0x1] %vm21_vm0, %v92_v32 }
  0xa0   :  { %v100_v42 = vld [vmem:[#allocation3] sm:$0x1] }
  0xa1   :  { %v101_v43 = vsel %vm21_vm0, %v100_v42, 0.0 }
  0xae   :  { %v48_v34 = vpop.xlane.xlu0 %47 }
 0x10a   :  { %v42_v33 = vpop.xlane.xlu1 %41 }
 0x10b   :  { %vm52_vm4 = vcmp.ge.f32.partialorder %v42_v33, %v48_v34 }
 0x10c   :  { %v133_v36 = vsel %vm52_vm4, 1.0, %v187_v3 }
 0x10d   :  { %v66_v39 = vsel %vm65_vm5, %v133_v36, 0.0 }
 0x10e   :  { %v45_v35 = vpop.xlane.xlu1 %44 }
 0x112   :  { %v51_v37 = vpop.xlane.xlu1 %50 }
 0x113   :  { %vm53_vm6 = vcmp.ge.f32.partialorder %v45_v35, %v51_v37 }
 0x114   :  { %v134_v38 = vsel %vm53_vm6, 1.0, %v187_v3 }
 0x115   :  { %v67_v40 = vsel %vm65_vm5, %v134_v38, 0.0 }
 0x116   :  { %v68_v41 = vadd.f32 %v67_v40, %v66_v39 }
 0x118   :  { %69 = vadd.xlane.f32.xlu1 %v68_v41 }
 0x11c   :  { %102 = vadd.xlane.f32.xlu1 %v101_v43 }
 0x1a1   :  { %v70_v44 = vpop.xlane.xlu1 %69 }
 0x1a2   :  { %v71_v45 = vrot.slane %v70_v44, 4 }
 0x1a4   :  { %v72_v46 = vadd.f32 %v71_v45, %v70_v44 }
 0x1a5   :  { %v103_v47 = vpop.xlane.xlu1 %102 }
 0x1a6   :  { %v73_v48 = vrot.slane %v72_v46, 2  ;;  %104 = vst.msk [vmem:[#allocation6] sm:$0x1] %vm19_vm7, %v103_v47 }
 0x1a7   :  { %153 = shalt.err (!%p150_p4)
}
 0x1a8   :  { %124 = dma.vmem_to_hbm [thread:$0]  %s122_s19, 16, %s244_s3, [#allocation7]   ;;  %v74_v49 = vadd.f32 %v73_v48, %v72_v46  ;;  %v64_v52 = vld [vmem:[#allocation2] sm:$0x1] }
 0x1a9   :  { %s189_s25 = smov [#allocation4]  }
 0x1aa   :  { %v75_v50 = vrot.slane %v74_v49, 1  ;;  %s111_s26 = sshll.u32 %s189_s25, 4  ;;  %s112_s26 = int_to_ptr.vmem [resolvable:$true] %s111_s26 }
 0x1ab   :  { %s162_s27 = scalar_lea.vmem %s112_s26, 16  ;;  %s166_s28 = scalar_lea.vmem %s112_s26, 32 }
 0x1ac   :  { %v76_v51 = vadd.f32 %v75_v50, %v74_v49  ;;  %p163_p5 = scmp.ne.s32.totalorder %s112_s26, %s162_s27  ;;  %p167_p6 = scmp.lt.s32.totalorder %s112_s26, %s112_s26 }
 0x1ad   :  { %p168_p7 = scmp.lt.s32.totalorder %s166_s28, %s162_s27 }
 0x1ae   :  { %135 = vpush %v76_v51 }
 0x1af   :  { %p169_p8 = por %p168_p7, %p167_p6 }
 0x1b1   :  { %p170_p9 = pnand %p169_p8, %p163_p5 }
 0x1df   :  { %s136_s24 = spop %135 }
 0x1e0   :  { %v78_v53 = vstv %s136_s24 }
 0x1e1   :  { %v79_v54 = vadd.f32 %v78_v53, %v64_v52 }
 0x1e3   :  { %81 = vst.msk [vmem:[#allocation2] sm:$0x1] %vm19_vm7, %v79_v54 }
 0x1ea   :  { %v98_v55 = vld [vmem:[#allocation2] sm:$0x1] }
 0x1eb   :  { %99 = vst.msk [vmem:[#allocation4] sm:$0x1] %vm19_vm7, %v98_v55 }
 0x1ec   :  { %173 = shalt.err (!%p170_p9)
}
 0x1ed   :  { %114 = dma.vmem_to_hbm [thread:$0]  %s112_s26, 16, %s243_s2, [#allocation5]  }
 0x1ee   :  { %182 = dma.done.wait [#allocation5], 16  }
 0x1ef   :  { %183 = vsyncadd [#allocation5], 4294967280 }
 0x1f0   :  { %184 = dma.done.wait [#allocation7], 16  }
 0x1f1   :  { %185 = vsyncadd [#allocation7], 4294967280 }
 0x1f2   :  { %131 = vsyncpa [#allocation5], 1 }
 0x1f3   :  { %132 = vsyncpa [#allocation7], 1 }

</bundles_post_ra>
